<compile_context>
chip_gen: v6e
topology: v6e:2x2x1
jax: 0.10.0
libtpu: 0.0.40
codegen_flags: <defaults>
</compile_context>

<pallas_src>
import numpy as np
import jax
import jax.numpy as jnp
from jax.experimental import pallas as pl
from jax.experimental.pallas import tpu as pltpu

# ---- module "parameters" (deterministic, identical to the torch __init__) ----
CHANNELS = 4
ALPHA = 1
GSIZE = 5
GPAD = GSIZE // 2


def _gkern1d(size=GSIZE):
    # Faithful to the torch source, including its exp(-n^2/2 * std^2) form.
    std = 0.3 * ((size - 1) * 0.5 - 1) + 0.8
    n = np.arange(size, dtype=np.float32) - (size - 1.0) / 2.0
    return np.exp(-(n ** 2) / 2 * std ** 2).astype(np.float32)


_GK1 = _gkern1d()
G1N = (_GK1 / _GK1.sum()).astype(np.float32)         # separable normalized taps
_GK2 = np.outer(_GK1, _GK1)
GKER = (_GK2 / _GK2.sum()).astype(np.float32)        # 2-D kernel (reference only)

# Symmetric taps: G1N[0]==G1N[4], G1N[1]==G1N[3].
_T0, _T1, _T2 = float(G1N[0]), float(G1N[1]), float(G1N[2])


# ------------------------------ kernel helpers --------------------------------
def _channel_sum_diff(gen_ref, gt_ref):
    """sum_c (gt_c - gen_c) in f32, reading one channel plane at a time."""
    C = gen_ref.shape[1]
    diff = (gt_ref[:, 0, :, :].astype(jnp.float32)
            - gen_ref[:, 0, :, :].astype(jnp.float32))
    for c in range(1, C):
        diff = diff + (gt_ref[:, c, :, :].astype(jnp.float32)
                       - gen_ref[:, c, :, :].astype(jnp.float32))
    return diff                                        # (B, H, W)


def _power_sum(gdx, gdy):
    if ALPHA == 1:                                      # static skip of the pow
        return gdx + gdy
    return gdx ** ALPHA + gdy ** ALPHA


# ------------------- general path: scratch with zero halo ---------------------
def _gradient_loss_kernel_scratch(gen_ref, gt_ref, out_ref, pad_ref):
    # gen_ref, gt_ref : (B, C, H, W) unpadded inputs for one batch block
    # out_ref         : (B, H, W)    output (channel dim squeezed)
    # pad_ref         : (B, H+2*GPAD, W+2*GPAD) VMEM scratch with zero border
    B, C, H, W = gen_ref.shape
    Hp, Wp = H + 2 * GPAD, W + 2 * GPAD

    diff = _channel_sum_diff(gen_ref, gt_ref)

    # (Re)write only the thin zero halo strips; the interior is fully
    # overwritten below, so no full-scratch zero pass is needed.
    pad_ref[:, 0:GPAD, :] = jnp.zeros((B, GPAD, Wp), jnp.float32)
    pad_ref[:, GPAD + H:Hp, :] = jnp.zeros((B, GPAD, Wp), jnp.float32)
    pad_ref[:, :, 0:GPAD] = jnp.zeros((B, Hp, GPAD), jnp.float32)
    pad_ref[:, :, GPAD + W:Wp] = jnp.zeros((B, Hp, GPAD), jnp.float32)
    pad_ref[:, GPAD:GPAD + H, GPAD:GPAD + W] = diff

    # Separable 5x5 Gaussian, symmetric taps.
    # H pass keeps the full padded width so the zero side columns survive in t.
    t = (_T0 * (pad_ref[:, 0:H, :] + pad_ref[:, 4:4 + H, :])
         + _T1 * (pad_ref[:, 1:1 + H, :] + pad_ref[:, 3:3 + H, :])
         + _T2 * pad_ref[:, 2:2 + H, :])                       # (B, H, Wp)
    # W pass on the value (zero halo columns of t provide the W padding).
    d = (_T0 * (t[:, :, 0:W] + t[:, :, 4:4 + W])
         + _T1 * (t[:, :, 1:1 + W] + t[:, :, 3:3 + W])
         + _T2 * t[:, :, 2:2 + W])                             # (B, H, W)

    # Finite differences with torch's explicit zero at the left/top conv-output
    # border: store d once and read two shifted windows -- rows/cols < GPAD of
    # the scratch are still zero, so the shifted reads pull exact zeros.
    pad_ref[:, GPAD:GPAD + H, GPAD:GPAD + W] = d
    d_left = pad_ref[:, GPAD:GPAD + H, GPAD - 1:GPAD - 1 + W]
    d_up = pad_ref[:, GPAD - 1:GPAD - 1 + H, GPAD:GPAD + W]

    out_ref[...] = _power_sum(jnp.abs(d - d_left), jnp.abs(d - d_up))


# --------------- aligned path: scratch-free, roll-based shifts ----------------
def _shift_zero(x, s, axis):
    """Shift x by s along `axis`, zeros shifted in: result[k] = x[k-s]."""
    size = x.shape[axis]
    rolled = pltpu.roll(x, s % size, axis=axis)
    idx = jax.lax.broadcasted_iota(jnp.int32, x.shape, dimension=axis)
    if s >= 0:
        return jnp.where(idx >= s, rolled, 0.0)
    return jnp.where(idx < size + s, rolled, 0.0)


def _gradient_loss_kernel_rolls(gen_ref, gt_ref, out_ref):
    # Used only when H % 8 == 0 and W % 128 == 0 (lane/sublane aligned tiles):
    # every shift is an XLU roll + VPU iota mask, so there are no VMEM scratch
    # stores, no misaligned loads and no d store/reload round trip.
    diff = _channel_sum_diff(gen_ref, gt_ref)                  # (B, H, W)

    def gauss(x, axis):
        return (_T2 * x
                + _T0 * (_shift_zero(x, 2, axis) + _shift_zero(x, -2, axis))
                + _T1 * (_shift_zero(x, 1, axis) + _shift_zero(x, -1, axis)))

    d = gauss(gauss(diff, 1), 2)                               # separable 5x5
    d_left = _shift_zero(d, 1, 2)                              # zero in col 0
    d_up = _shift_zero(d, 1, 1)                                # zero in row 0
    out_ref[...] = _power_sum(jnp.abs(d - d_left), jnp.abs(d - d_up))


# ------------------------------ wrapper (glue) ---------------------------------
def _rup(x, m):
    return -(-x // m) * m


def _chip_config():
    kind = ""
    try:
        kind = jax.devices()[0].device_kind.lower()
    except Exception:
        pass
    if ("v7" in kind) or ("tpu7" in kind) or ("7x" in kind):
        # v7x: 64 MiB VMEM per TensorCore, 2 TCs per chip -> smaller blocks,
        # >= 2 grid steps per core, conservative VMEM cap with headroom.
        return dict(target_bytes=4 << 20, vmem_cap=48 << 20, min_steps=4)
    # v5e / v6e (and default): 128 MiB VMEM, 1 TC.  The explicit limit also
    # lifts v5e's 16 MiB default scoped-VMEM cap.
    return dict(target_bytes=8 << 20, vmem_cap=96 << 20, min_steps=2)


def _pick_batch_block(N, C, H, W, *, target_bytes, min_steps):
    """Batch items per grid step: big enough to amortize the ~0.35us per-step
    overhead, small enough to keep >= min_steps grid steps.  Layout-aware:
    planes occupy (8,128)-padded tiles in VMEM."""
    per_item = 2 * C * _rup(H, 8) * _rup(W, 128) * 4       # both inputs, f32
    want = max(1, target_bytes // per_item)
    cap = max(1, N // min_steps)
    b = int(min(want, cap, N))
    while N % b:                                            # divisor of N
        b -= 1
    return max(b, 1)


def gradient_loss(gen_frames, gt_frames, *, batch_block=None):
    N, C, H, W = gen_frames.shape
    assert gt_frames.shape == gen_frames.shape
    cfg = _chip_config()
    bblk = (_pick_batch_block(N, C, H, W, target_bytes=cfg["target_bytes"],
                              min_steps=cfg["min_steps"])
            if batch_block is None else batch_block)
    assert N % bblk == 0, "batch block must divide N"
    Hp, Wp = H + 2 * GPAD, W + 2 * GPAD

    aligned = (H % 8 == 0) and (W % 128 == 0)
    if aligned:
        kernel = _gradient_loss_kernel_rolls
        scratch_shapes = []
        scratch_bytes = 0
    else:
        kernel = _gradient_loss_kernel_scratch
        scratch_shapes = [pltpu.VMEM((bblk, Hp, Wp), jnp.float32)]
        scratch_bytes = bblk * _rup(Hp, 8) * _rup(Wp, 128) * 4

    # Layout-aware VMEM estimate: 2 inputs x 2 pipeline buffers + output x 2
    # buffers + scratch, with (8,128) tile padding, plus 2x headroom.
    plane = _rup(H, 8) * _rup(W, 128) * 4
    est = 2 * 2 * bblk * C * plane + 2 * bblk * plane + scratch_bytes
    vmem_limit = int(min(cfg["vmem_cap"], max(2 * est, 32 << 20)))

    # TODO(synk): very large images (a bblk=1 block that exceeds ~40 MiB with
    # double buffering, e.g. 4x1024x1024 f32) need an H-tiled variant with a
    # GPAD-row halo to fit v7x's 64 MiB VMEM; not implemented here.
    return pl.pallas_call(
        kernel,
        out_shape=jax.ShapeDtypeStruct((N, 1, H, W), jnp.float32),
        grid_spec=pltpu.PrefetchScalarGridSpec(
            num_scalar_prefetch=0,
            grid=(N // bblk,),
            in_specs=[
                pl.BlockSpec((bblk, C, H, W), lambda n: (n, 0, 0, 0)),
                pl.BlockSpec((bblk, C, H, W), lambda n: (n, 0, 0, 0)),
            ],
            out_specs=pl.BlockSpec((bblk, None, H, W), lambda n: (n, 0, 0, 0)),
            scratch_shapes=scratch_shapes,
        ),
        compiler_params=pltpu.CompilerParams(
            dimension_semantics=("parallel",),
            vmem_limit_bytes=vmem_limit),
    )(gen_frames, gt_frames)


# ------------------------------ numpy reference --------------------------------
def _reference(gen, gt):
    gen = np.asarray(gen, np.float32)
    gt = np.asarray(gt, np.float32)
    N, C, H, W = gen.shape

    def gconv(x):
        xp = np.pad(x, ((0, 0), (0, 0), (GPAD, GPAD), (GPAD, GPAD)))
        out = np.zeros((N, C, H, W), np.float32)
        for i in range(GSIZE):
            for j in range(GSIZE):
                out += GKER[i, j] * xp[:, :, i:i + H, j:j + W]
        return out

    gs, ts = gconv(gen), gconv(gt)

    def dx(x):  # pad left by 1, conv [-1, 1] along W, sum channels
        xp = np.pad(x, ((0, 0), (0, 0), (0, 0), (1, 0)))
        return np.sum(xp[:, :, :, 1:] - xp[:, :, :, :-1], axis=1, keepdims=True)

    def dy(x):  # pad top by 1, conv [-1, 1] along H, sum channels
        xp = np.pad(x, ((0, 0), (0, 0), (1, 0), (0, 0)))
        return np.sum(xp[:, :, 1:, :] - xp[:, :, :-1, :], axis=1, keepdims=True)

    gdx, gdy, tdx, tdy = dx(gs), dy(gs), dx(ts), dy(ts)
    return np.abs(tdx - gdx) ** ALPHA + np.abs(tdy - gdy) ** ALPHA


if __name__ == "__main__":
    key = jax.random.PRNGKey(0)
    k1, k2 = jax.random.split(key)
    N, C, H, W = 2, CHANNELS, 16, 16
    gen = jax.random.normal(k1, (N, C, H, W), dtype=jnp.float32)
    gt = jax.random.normal(k2, (N, C, H, W), dtype=jnp.float32)

    out = jax.block_until_ready(gradient_loss(gen, gt))
    ref = _reference(gen, gt)
    np.testing.assert_allclose(np.asarray(out), ref, rtol=1e-4, atol=2e-5)
    assert out.shape == (N, 1, H, W)
    print("KERNEL_OK")
</pallas_src>

<mosaic_0001>
module attributes {stable_mosaic.version = 11 : i64} {
  func.func @_gradient_loss_kernel_scratch(%arg0: i32, %arg1: memref<1x4x16x16xf32, #tpu.memory_space<vmem>>, %arg2: memref<1x4x16x16xf32, #tpu.memory_space<vmem>>, %arg3: memref<1x1x16x16xf32, #tpu.memory_space<vmem>>, %arg4: memref<1x20x20xf32, #tpu.memory_space<vmem>>) attributes {dimension_semantics = [#tpu.dimension_semantics<parallel>], iteration_bounds = array<i64: 2>, scalar_prefetch = 0 : i64, scratch_operands = 1 : i64, tpu.core_type = #tpu.core_type<tc>, window_params = [{transform_indices = @transform_0, window_bounds = array<i64: 1, 4, 16, 16>}, {transform_indices = @transform_1, window_bounds = array<i64: 1, 4, 16, 16>}, {transform_indices = @transform_2, window_bounds = array<i64: 1, 1, 16, 16>}]} {
    %c0 = arith.constant 0 : index
    %c0_0 = arith.constant 0 : index
    %c0_1 = arith.constant 0 : index
    %c0_2 = arith.constant 0 : index
    %0 = vector.load %arg2[%c0, %c0_0, %c0_1, %c0_2] : memref<1x4x16x16xf32, #tpu.memory_space<vmem>>, vector<1x1x16x16xf32>
    %1 = vector.shape_cast %0 : vector<1x1x16x16xf32> to vector<1x16x16xf32>
    %c0_3 = arith.constant 0 : index
    %c0_4 = arith.constant 0 : index
    %c0_5 = arith.constant 0 : index
    %c0_6 = arith.constant 0 : index
    %2 = vector.load %arg1[%c0_3, %c0_4, %c0_5, %c0_6] : memref<1x4x16x16xf32, #tpu.memory_space<vmem>>, vector<1x1x16x16xf32>
    %3 = vector.shape_cast %2 : vector<1x1x16x16xf32> to vector<1x16x16xf32>
    %4 = arith.subf %1, %3 : vector<1x16x16xf32>
    %c0_7 = arith.constant 0 : index
    %c1 = arith.constant 1 : index
    %c0_8 = arith.constant 0 : index
    %c0_9 = arith.constant 0 : index
    %5 = vector.load %arg2[%c0_7, %c1, %c0_8, %c0_9] : memref<1x4x16x16xf32, #tpu.memory_space<vmem>>, vector<1x1x16x16xf32>
    %6 = vector.shape_cast %5 : vector<1x1x16x16xf32> to vector<1x16x16xf32>
    %c0_10 = arith.constant 0 : index
    %c1_11 = arith.constant 1 : index
    %c0_12 = arith.constant 0 : index
    %c0_13 = arith.constant 0 : index
    %7 = vector.load %arg1[%c0_10, %c1_11, %c0_12, %c0_13] : memref<1x4x16x16xf32, #tpu.memory_space<vmem>>, vector<1x1x16x16xf32>
    %8 = vector.shape_cast %7 : vector<1x1x16x16xf32> to vector<1x16x16xf32>
    %9 = arith.subf %6, %8 : vector<1x16x16xf32>
    %10 = arith.addf %4, %9 : vector<1x16x16xf32>
    %c0_14 = arith.constant 0 : index
    %c2 = arith.constant 2 : index
    %c0_15 = arith.constant 0 : index
    %c0_16 = arith.constant 0 : index
    %11 = vector.load %arg2[%c0_14, %c2, %c0_15, %c0_16] : memref<1x4x16x16xf32, #tpu.memory_space<vmem>>, vector<1x1x16x16xf32>
    %12 = vector.shape_cast %11 : vector<1x1x16x16xf32> to vector<1x16x16xf32>
    %c0_17 = arith.constant 0 : index
    %c2_18 = arith.constant 2 : index
    %c0_19 = arith.constant 0 : index
    %c0_20 = arith.constant 0 : index
    %13 = vector.load %arg1[%c0_17, %c2_18, %c0_19, %c0_20] : memref<1x4x16x16xf32, #tpu.memory_space<vmem>>, vector<1x1x16x16xf32>
    %14 = vector.shape_cast %13 : vector<1x1x16x16xf32> to vector<1x16x16xf32>
    %15 = arith.subf %12, %14 : vector<1x16x16xf32>
    %16 = arith.addf %10, %15 : vector<1x16x16xf32>
    %c0_21 = arith.constant 0 : index
    %c3 = arith.constant 3 : index
    %c0_22 = arith.constant 0 : index
    %c0_23 = arith.constant 0 : index
    %17 = vector.load %arg2[%c0_21, %c3, %c0_22, %c0_23] : memref<1x4x16x16xf32, #tpu.memory_space<vmem>>, vector<1x1x16x16xf32>
    %18 = vector.shape_cast %17 : vector<1x1x16x16xf32> to vector<1x16x16xf32>
    %c0_24 = arith.constant 0 : index
    %c3_25 = arith.constant 3 : index
    %c0_26 = arith.constant 0 : index
    %c0_27 = arith.constant 0 : index
    %19 = vector.load %arg1[%c0_24, %c3_25, %c0_26, %c0_27] : memref<1x4x16x16xf32, #tpu.memory_space<vmem>>, vector<1x1x16x16xf32>
    %20 = vector.shape_cast %19 : vector<1x1x16x16xf32> to vector<1x16x16xf32>
    %21 = arith.subf %18, %20 : vector<1x16x16xf32>
    %22 = arith.addf %16, %21 : vector<1x16x16xf32>
    %cst = arith.constant 0.000000e+00 : f32
    %23 = vector.broadcast %cst : f32 to vector<1x2x20xf32>
    %c0_28 = arith.constant 0 : index
    %c0_29 = arith.constant 0 : index
    %c0_30 = arith.constant 0 : index
    %24 = vector.load %arg4[%c0_28, %c0_29, %c0_30] : memref<1x20x20xf32, #tpu.memory_space<vmem>>, vector<1x2x20xf32>
    tpu.vector_store %arg4[%c0_28, %c0_29, %c0_30], %23 {strides = array<i32>} : memref<1x20x20xf32, #tpu.memory_space<vmem>>, vector<1x2x20xf32>,
    %cst_31 = arith.constant 0.000000e+00 : f32
    %25 = vector.broadcast %cst_31 : f32 to vector<1x2x20xf32>
    %c0_32 = arith.constant 0 : index
    %c18 = arith.constant 18 : index
    %c0_33 = arith.constant 0 : index
    %26 = vector.load %arg4[%c0_32, %c18, %c0_33] : memref<1x20x20xf32, #tpu.memory_space<vmem>>, vector<1x2x20xf32>
    tpu.vector_store %arg4[%c0_32, %c18, %c0_33], %25 {strides = array<i32>} : memref<1x20x20xf32, #tpu.memory_space<vmem>>, vector<1x2x20xf32>,
    %cst_34 = arith.constant 0.000000e+00 : f32
    %27 = vector.broadcast %cst_34 : f32 to vector<1x20x2xf32>
    %c0_35 = arith.constant 0 : index
    %c0_36 = arith.constant 0 : index
    %c0_37 = arith.constant 0 : index
    %28 = vector.load %arg4[%c0_35, %c0_36, %c0_37] : memref<1x20x20xf32, #tpu.memory_space<vmem>>, vector<1x20x2xf32>
    tpu.vector_store %arg4[%c0_35, %c0_36, %c0_37], %27 {strides = array<i32>} : memref<1x20x20xf32, #tpu.memory_space<vmem>>, vector<1x20x2xf32>,
    %cst_38 = arith.constant 0.000000e+00 : f32
    %29 = vector.broadcast %cst_38 : f32 to vector<1x20x2xf32>
    %c0_39 = arith.constant 0 : index
    %c0_40 = arith.constant 0 : index
    %c18_41 = arith.constant 18 : index
    %30 = vector.load %arg4[%c0_39, %c0_40, %c18_41] : memref<1x20x20xf32, #tpu.memory_space<vmem>>, vector<1x20x2xf32>
    tpu.vector_store %arg4[%c0_39, %c0_40, %c18_41], %29 {strides = array<i32>} : memref<1x20x20xf32, #tpu.memory_space<vmem>>, vector<1x20x2xf32>,
    %c0_42 = arith.constant 0 : index
    %c2_43 = arith.constant 2 : index
    %c2_44 = arith.constant 2 : index
    %31 = vector.load %arg4[%c0_42, %c2_43, %c2_44] : memref<1x20x20xf32, #tpu.memory_space<vmem>>, vector<1x16x16xf32>
    tpu.vector_store %arg4[%c0_42, %c2_43, %c2_44], %22 {strides = array<i32>} : memref<1x20x20xf32, #tpu.memory_space<vmem>>, vector<1x16x16xf32>,
    %c0_45 = arith.constant 0 : index
    %c0_46 = arith.constant 0 : index
    %c0_47 = arith.constant 0 : index
    %32 = vector.load %arg4[%c0_45, %c0_46, %c0_47] : memref<1x20x20xf32, #tpu.memory_space<vmem>>, vector<1x16x20xf32>
    %c0_48 = arith.constant 0 : index
    %c4 = arith.constant 4 : index
    %c0_49 = arith.constant 0 : index
    %33 = vector.load %arg4[%c0_48, %c4, %c0_49] : memref<1x20x20xf32, #tpu.memory_space<vmem>>, vector<1x16x20xf32>
    %34 = arith.addf %32, %33 : vector<1x16x20xf32>
    %cst_50 = arith.constant 0.0391726531 : f32
    %35 = vector.broadcast %cst_50 : f32 to vector<1x16x20xf32>
    %36 = arith.mulf %35, %34 : vector<1x16x20xf32>
    %c0_51 = arith.constant 0 : index
    %c1_52 = arith.constant 1 : index
    %c0_53 = arith.constant 0 : index
    %37 = vector.load %arg4[%c0_51, %c1_52, %c0_53] : memref<1x20x20xf32, #tpu.memory_space<vmem>>, vector<1x16x20xf32>
    %c0_54 = arith.constant 0 : index
    %c3_55 = arith.constant 3 : index
    %c0_56 = arith.constant 0 : index
    %38 = vector.load %arg4[%c0_54, %c3_55, %c0_56] : memref<1x20x20xf32, #tpu.memory_space<vmem>>, vector<1x16x20xf32>
    %39 = arith.addf %37, %38 : vector<1x16x20xf32>
    %cst_57 = arith.constant 0.24056226 : f32
    %40 = vector.broadcast %cst_57 : f32 to vector<1x16x20xf32>
    %41 = arith.mulf %40, %39 : vector<1x16x20xf32>
    %42 = arith.addf %36, %41 : vector<1x16x20xf32>
    %c0_58 = arith.constant 0 : index
    %c2_59 = arith.constant 2 : index
    %c0_60 = arith.constant 0 : index
    %43 = vector.load %arg4[%c0_58, %c2_59, %c0_60] : memref<1x20x20xf32, #tpu.memory_space<vmem>>, vector<1x16x20xf32>
    %cst_61 = arith.constant 0.440530211 : f32
    %44 = vector.broadcast %cst_61 : f32 to vector<1x16x20xf32>
    %45 = arith.mulf %44, %43 : vector<1x16x20xf32>
    %46 = arith.addf %42, %45 : vector<1x16x20xf32>
    %47 = vector.extract_strided_slice %46 {offsets = [0, 0, 0], sizes = [1, 16, 16], strides = [1, 1, 1]} : vector<1x16x20xf32> to vector<1x16x16xf32>
    %48 = vector.extract_strided_slice %46 {offsets = [0, 0, 4], sizes = [1, 16, 16], strides = [1, 1, 1]} : vector<1x16x20xf32> to vector<1x16x16xf32>
    %49 = arith.addf %47, %48 : vector<1x16x16xf32>
    %cst_62 = arith.constant 0.0391726531 : f32
    %50 = vector.broadcast %cst_62 : f32 to vector<1x16x16xf32>
    %51 = arith.mulf %50, %49 : vector<1x16x16xf32>
    %52 = vector.extract_strided_slice %46 {offsets = [0, 0, 1], sizes = [1, 16, 16], strides = [1, 1, 1]} : vector<1x16x20xf32> to vector<1x16x16xf32>
    %53 = vector.extract_strided_slice %46 {offsets = [0, 0, 3], sizes = [1, 16, 16], strides = [1, 1, 1]} : vector<1x16x20xf32> to vector<1x16x16xf32>
    %54 = arith.addf %52, %53 : vector<1x16x16xf32>
    %cst_63 = arith.constant 0.24056226 : f32
    %55 = vector.broadcast %cst_63 : f32 to vector<1x16x16xf32>
    %56 = arith.mulf %55, %54 : vector<1x16x16xf32>
    %57 = arith.addf %51, %56 : vector<1x16x16xf32>
    %58 = vector.extract_strided_slice %46 {offsets = [0, 0, 2], sizes = [1, 16, 16], strides = [1, 1, 1]} : vector<1x16x20xf32> to vector<1x16x16xf32>
    %cst_64 = arith.constant 0.440530211 : f32
    %59 = vector.broadcast %cst_64 : f32 to vector<1x16x16xf32>
    %60 = arith.mulf %59, %58 : vector<1x16x16xf32>
    %61 = arith.addf %57, %60 : vector<1x16x16xf32>
    %c0_65 = arith.constant 0 : index
    %c2_66 = arith.constant 2 : index
    %c2_67 = arith.constant 2 : index
    %62 = vector.load %arg4[%c0_65, %c2_66, %c2_67] : memref<1x20x20xf32, #tpu.memory_space<vmem>>, vector<1x16x16xf32>
    tpu.vector_store %arg4[%c0_65, %c2_66, %c2_67], %61 {strides = array<i32>} : memref<1x20x20xf32, #tpu.memory_space<vmem>>, vector<1x16x16xf32>,
    %c0_68 = arith.constant 0 : index
    %c2_69 = arith.constant 2 : index
    %c1_70 = arith.constant 1 : index
    %63 = vector.load %arg4[%c0_68, %c2_69, %c1_70] : memref<1x20x20xf32, #tpu.memory_space<vmem>>, vector<1x16x16xf32>
    %c0_71 = arith.constant 0 : index
    %c1_72 = arith.constant 1 : index
    %c2_73 = arith.constant 2 : index
    %64 = vector.load %arg4[%c0_71, %c1_72, %c2_73] : memref<1x20x20xf32, #tpu.memory_space<vmem>>, vector<1x16x16xf32>
    %65 = arith.subf %61, %63 : vector<1x16x16xf32>
    %66 = math.absf %65 : vector<1x16x16xf32>
    %67 = arith.subf %61, %64 : vector<1x16x16xf32>
    %68 = math.absf %67 : vector<1x16x16xf32>
    %69 = arith.addf %66, %68 : vector<1x16x16xf32>
    %c0_74 = arith.constant 0 : index
    %c0_75 = arith.constant 0 : index
    %c0_76 = arith.constant 0 : index
    %c0_77 = arith.constant 0 : index
    %70 = vector.load %arg3[%c0_74, %c0_75, %c0_76, %c0_77] : memref<1x1x16x16xf32, #tpu.memory_space<vmem>>, vector<1x1x16x16xf32>
    %71 = vector.shape_cast %70 : vector<1x1x16x16xf32> to vector<1x16x16xf32>
    %72 = vector.shape_cast %69 : vector<1x16x16xf32> to vector<1x1x16x16xf32>
    tpu.vector_store %arg3[%c0_74, %c0_75, %c0_76, %c0_77], %72 {strides = array<i32>} : memref<1x1x16x16xf32, #tpu.memory_space<vmem>>, vector<1x1x16x16xf32>,
    return
  }
  func.func @transform_0(%arg0: i32) -> (i32, i32, i32, i32) {
    %c0_i32 = arith.constant 0 : i32
    %c0_i32_0 = arith.constant 0 : i32
    %c0_i32_1 = arith.constant 0 : i32
    %c0_i32_2 = arith.constant 0 : i32
    return %arg0, %c0_i32, %c0_i32_0, %c0_i32_1 : i32, i32, i32, i32
  }
  func.func @transform_1(%arg0: i32) -> (i32, i32, i32, i32) {
    %c0_i32 = arith.constant 0 : i32
    %c0_i32_0 = arith.constant 0 : i32
    %c0_i32_1 = arith.constant 0 : i32
    %c0_i32_2 = arith.constant 0 : i32
    return %arg0, %c0_i32, %c0_i32_0, %c0_i32_1 : i32, i32, i32, i32
  }
  func.func @transform_2(%arg0: i32) -> (i32, i32, i32, i32) {
    %c0_i32 = arith.constant 0 : i32
    %c0_i32_0 = arith.constant 0 : i32
    %c0_i32_1 = arith.constant 0 : i32
    %c0_i32_2 = arith.constant 0 : i32
    return %arg0, %c0_i32, %c0_i32_0, %c0_i32_1 : i32, i32, i32, i32
  }
}

</mosaic_0001>

<bundles_post_ra>
// kernel: tpu_custom_call.1
= control target key start
LH: loop header
LB: loop body
LE: loop exit
PB: predicated region body
PF: predicated region fallthrough
CT: control target
= control target key end

     0   :  { %7 = vsyncpa [#allocation4], 0  ;;  %s986_s0 = inlined_call_operand.hbm [shape: f32[2,4,16,16], index: 0, kind: input, shape index: {}]   ;;  %s987_s1 = inlined_call_operand.hbm [shape: f32[2,4,16,16], index: 1, kind: input, shape index: {}]   ;;  %s988_s2 = inlined_call_operand.hbm [shape: f32[2,1,16,16], index: 2, kind: output, shape index: {}]  }
   0x1   :  { %9 = vsyncpa [#allocation4 + $0x1], 0 }
   0x2   :  { %10 = vsyncpa [#allocation7], 0 }
   0x3   :  { %12 = vsyncpa [#allocation7 + $0x1], 0 }
   0x4   :  { %13 = vsyncpa [#allocation5], 0 }
   0x5   :  { %15 = vsyncpa [#allocation5 + $0x1], 0  ;;  %s729_s9 = smov 0   ;;  %s731_s10 = smov 0  }
   0x6   :  { %s733_s11 = smov 0   ;;  %s735_s12 = smov 0  }
   0x7 LB: > { %s750_s13 = sadd.s32 4294967295, %s700_s12   ;;  %s483_s14 = sadd.s32 4294967294, %s700_s12   ;;  %s700_s12 = sphi %s735_s12, %s1004_s12   ;;  %s696_s11 = sphi %s733_s11, %s1003_s11   ;;  %s692_s10 = sphi %s731_s10, %s1002_s10   ;;  %s688_s9 = sphi %s729_s9, %s1001_s9  }
   0x8   : > { %s754_s15 = sadd.s32 1, %s700_s12   ;;  %s28_s16 = sadd.s32 1, %s696_s11 }
   0x9   : > { %s25_s17 = ssub.s32 %s700_s12, %s754_s15  ;;  %p35_p0 = scmp.ne.s32.totalorder %s696_s11, %s692_s10 }
   0xa   : > { %p26_p1 = scmp.eq.s32.totalorder %s25_s17, 0  ;;  %p36_p2 = scmp.eq.s32.totalorder %s700_s12, 0 }
   0xb   : > { %p41_p3 = scmp.ne.s32.totalorder %s692_s10, %s688_s9  ;;  %p42_p4 = scmp.eq.s32.totalorder %s750_s13, 0 }
   0xc   : > { %s766_s18 = scalar_select %p26_p1, %s696_s11, %s28_s16  }
   0xd   : > { %p768_p5 = por %p36_p2, %p35_p0  ;;  %p772_p6 = por %p42_p4, %p41_p3 }
   0xe   : > { %p91_p7 = scmp.eq.s32.totalorder %s750_s13, 1  ;;  %p97_p8 = scmp.eq.s32.totalorder %s483_s14, 1 }
   0xf   : > { %s992_s20 = scalar_select %p772_p6, 1, 0 }
  0x10   : > { %p533_p10 = scmp.lt.s32.totalorder %s700_s12, 2  ;;  %p779_p11 = por %p91_p7, %p35_p0 }
  0x11   : > { %p783_p12 = por %p97_p8, %p41_p3  ;;  %s788_s23 = sand.u32 1, %s696_s11  }
  0x12   : > { %s993_s21 = scalar_select %p779_p11, 1, 0 }
  0x13   : > { %s994_s22 = scalar_select %p783_p12, 1, 0 }
  0x14   : > { %s513_s24 = sshll.u32 %s700_s12, 10  ;;  %s486_s25 = sshll.u32 %s788_s23, 6 }
  0x15   : > { %s797_s28 = scalar_lea.hbm %s986_s0, %s513_s24  ;;  %s121_s29 = scalar_lea.vmem [#allocation3], %s486_s25 }
  0x16   : > { %s128_s30 = sshll.u32 %s121_s29, 4  ;;  %p803_p13 = pnand %p533_p10, %p768_p5  ;;  %s807_s30 = int_to_ptr.vmem [resolvable:$true] %s128_s30 }
  0x17   : > { %s118_s4 = scalar_lea.sflag [#allocation4], %s788_s23  ;;  %s576_s5 = scalar_lea.hbm %s797_s28, 1024 }
  0x18   : > { %p577_p0 = scmp.ne.s32.totalorder %s797_s28, %s576_s5  ;;  %p578_p1 = pneg %p803_p13 }
  0x19   : > { %s581_s8 = scalar_lea.hbm %s986_s0, 2048  ;;  %p582_p4 = scmp.lt.s32.totalorder %s797_s28, %s986_s0 }
  0x1a   : > { %p579_p2 = pnand %p578_p1, %p577_p0  ;;  %p583_p5 = scmp.lt.s32.totalorder %s581_s8, %s576_s5 }
  0x1c   : > { %p580_p3 = pneg %p579_p2  ;;  %p584_p7 = por %p583_p5, %p582_p4 }
  0x1e   : > { %p585_p8 = pnand %p584_p7, %p580_p3 }
  0x20   : > { %588 = shalt.err (!%p585_p8)
}
  0x21   : > { %s589_s17 = scalar_lea.vmem %s807_s30, 1024  ;;  %s702_s19 = smov [#allocation3]  }
  0x22   : > { %p590_p10 = scmp.ne.s32.totalorder %s807_s30, %s589_s17  ;;  %s594_s26 = sshll.u32 %s702_s19, 4  ;;  %s595_s26 = int_to_ptr.vmem [resolvable:$false] %s594_s26 }
  0x23   : > { %s596_s27 = scalar_lea.vmem %s595_s26, 2048  ;;  %p597_p9 = scmp.lt.s32.totalorder %s807_s30, %s595_s26 }
  0x24   : > { %p592_p0 = pnand %p590_p10, %p578_p1  ;;  %p598_p12 = scmp.lt.s32.totalorder %s596_s27, %s589_s17 }
  0x26   : > { %p593_p2 = pneg %p592_p0  ;;  %p599_p11 = por %p598_p12, %p597_p9 }
  0x28   : > { %p600_p4 = pnand %p599_p11, %p593_p2 }
  0x2a   : > { %603 = shalt.err (!%p600_p4)
}
  0x2b   : > { %s703_s29 = smov 128   ;;  %s704_s5 = smov 8  }
  0x2c   : > { %525 = dma.hbm_to_vmem [thread:$0]  (!%p803_p13), %s797_s28, 1024, %s807_s30, %s118_s4, %s703_s29, %s703_s29, %s704_s5  }
  0x2d   : > { %p492_p9 = scmp.ge.s32.totalorder %s700_s12, 1  ;;  %p157_p11 = scmp.lt.s32.totalorder %s700_s12, 3 }
  0x2e   : > { %s850_s14 = scalar_lea.hbm %s987_s1, %s513_s24  ;;  %s142_s16 = scalar_lea.vmem [#allocation6], %s486_s25 }
  0x2f   : > { %p841_p12 = pnand %p492_p9, %p157_p11  ;;  %s149_s17 = sshll.u32 %s142_s16, 4  ;;  %s854_s17 = int_to_ptr.vmem [resolvable:$true] %s149_s17 }
  0x30   : > { %s139_s28 = scalar_lea.sflag [#allocation7], %s788_s23  ;;  %s604_s30 = scalar_lea.hbm %s850_s14, 1024 }
  0x31   : > { %p605_p3 = scmp.ne.s32.totalorder %s850_s14, %s604_s30  ;;  %s609_s24 = scalar_lea.hbm %s987_s1, 2048 }
  0x32   : > { %p610_p8 = scmp.lt.s32.totalorder %s850_s14, %s987_s1  ;;  %p611_p10 = scmp.lt.s32.totalorder %s609_s24, %s604_s30 }
  0x33   : > { %p607_p5 = pnand %p605_p3, %p578_p1 }
  0x34   : > { %p612_p0 = por %p611_p10, %p610_p8 }
  0x35   : > { %p608_p7 = pneg %p607_p5 }
  0x37   : > { %p613_p2 = pnand %p612_p0, %p608_p7 }
  0x39   : > { %616 = shalt.err (!%p613_p2)
}
  0x3a   : > { %s617_s23 = scalar_lea.vmem %s854_s17, 1024  ;;  %s705_s25 = smov [#allocation6]  }
  0x3b   : > { %p618_p4 = scmp.ne.s32.totalorder %s854_s17, %s617_s23  ;;  %s622_s7 = sshll.u32 %s705_s25, 4  ;;  %s623_s7 = int_to_ptr.vmem [resolvable:$false] %s622_s7 }
  0x3c   : > { %s624_s8 = scalar_lea.vmem %s623_s7, 2048  ;;  %p625_p3 = scmp.lt.s32.totalorder %s854_s17, %s623_s7 }
  0x3d   : > { %p620_p9 = pnand %p618_p4, %p578_p1  ;;  %p626_p5 = scmp.lt.s32.totalorder %s624_s8, %s617_s23 }
  0x3f   : > { %p621_p11 = pneg %p620_p9  ;;  %p627_p6 = por %p626_p5, %p625_p3 }
  0x41   : > { %p628_p8 = pnand %p627_p6, %p621_p11 }
  0x43   : > { %631 = shalt.err (!%p628_p8)
}
  0x44   : > { %528 = dma.hbm_to_vmem [thread:$0]  (!%p803_p13), %s850_s14, 1024, %s854_s17, %s139_s28, %s703_s29, %s703_s29, %s704_s5  }
  0x45   : > { %161 = sbr.rel (%p841_p12) target bundleno = 731 (0x2db), region = 28  ;;  %s885_s16 = sand.u32 (!%p841_p12), 1, %s692_s10  }
  0x46   : > { %s493_s30 = sshll.u32 (!%p841_p12), %s885_s16, 6  ;;  %s164_s4 = scalar_lea.sflag (!%p841_p12), [#allocation4], %s885_s16 }
  0x47   : > { %s889_s19 = scalar_lea.vmem (!%p841_p12), [#allocation3], %s493_s30  ;;  %p997_p6 = scmp.ne.s32.totalorder (!%p841_p12), %s992_s20, 0 }
  0x4a   : > { %675 = dma.done.wait (%p997_p6), %s164_s4, 1024  }
  0x4b   : > { %677 = vsyncadd (%p997_p6), %s164_s4, 4294966272  ;;  %s173_s3 = scalar_lea.sflag [#allocation7], %s885_s16  ;;  %s896_s29 = scalar_lea.vmem [#allocation6], %s493_s30 }
  0x4c   : > { %679 = dma.done.wait (%p997_p6), %s173_s3, 1024  }
  0x4d   : > { %681 = vsyncadd (%p997_p6), %s173_s3, 4294966272  ;;  %vm238_vm0 = vcmask 156672   ;;  %vm241_vm1 = vcmask 15360   ;;  %vm246_vm2 = vcmask 162960   ;;  %v706_v0 = vmov 0.0   ;;  %v202_v1 = vld [vmem:[%s896_s29] sm:$0xff] }
  0x4e   : > { %239 = vst.msk [vmem:[#allocation2] sm:$0x3] %vm238_vm0, %v706_v0  ;;  %240 = vst.msk [vmem:[#allocation2 + $0x12] sm:$0x3] %vm238_vm0, %v706_v0  ;;  %vm244_vm3 = vcmask 11264   ;;  %vm249_vm4 = vcmask 158864  }
  0x4f   : > { %243 = vst.msk [vmem:[#allocation2 + $0x8] sm:$0xff] %vm241_vm1, %v706_v0  ;;  %242 = vst.msk [vmem:[#allocation2] sm:$0xff] %vm241_vm1, %v706_v0  ;;  %v204_v2 = vld [vmem:[%s889_s19] sm:$0xff]  ;;  %v496_v3 = vld [vmem:[%s896_s29 + $0x10] sm:$0xff]  ;;  %s707_s20 = smov 2   ;;  %vm259_vm5 = vcmask 146448  }
  0x50   : > { %248 = vst.msk [vmem:[#allocation2 + $0x8] sm:$0xff] %vm246_vm2, %v706_v0  ;;  %247 = vst.msk [vmem:[#allocation2] sm:$0xff] %vm246_vm2, %v706_v0  ;;  %v206_v4 = vsub.f32 %v202_v1, %v204_v2  ;;  %v498_v5 = vld [vmem:[%s889_s19 + $0x10] sm:$0xff]  ;;  %v500_v6 = vld [vmem:[%s896_s29 + $0x20] sm:$0xff]  ;;  %s708_s5 = smov 124   ;;  %s709_s6 = smov 126  }
  0x51   : > { %245 = vst.msk [vmem:[#allocation2 + $0x10] sm:$0xf] %vm244_vm3, %v706_v0  ;;  %v502_v7 = vld [vmem:[%s889_s19 + $0x20] sm:$0xff]  ;;  %v214_v8 = vsub.f32 %v496_v3, %v498_v5  ;;  %v504_v10 = vld [vmem:[%s896_s29 + $0x30] sm:$0xff]  ;;  %v203_v12 = vld [vmem:[%s896_s29 + $0x8] sm:$0xff]  ;;  %s710_s14 = smov 127  }
  0x52   : > { %250 = vst.msk [vmem:[#allocation2 + $0x10] sm:$0xf] %vm249_vm4, %v706_v0  ;;  %v224_v9 = vsub.f32 %v500_v6, %v502_v7  ;;  %v506_v11 = vld [vmem:[%s889_s19 + $0x30] sm:$0xff]  ;;  %v205_v13 = vld [vmem:[%s889_s19 + $0x8] sm:$0xff]  ;;  %v497_v14 = vld [vmem:[%s896_s29 + $0x18] sm:$0xff]  ;;  %s495_s17 = sshll.u32 %s885_s16, 4 }
  0x53   : > { %v499_v15 = vld [vmem:[%s889_s19 + $0x18] sm:$0xff]  ;;  %v216_v16 = vadd.f32 %v214_v8, %v206_v4  ;;  %v234_v17 = vsub.f32 %v504_v10, %v506_v11  ;;  %v207_v18 = vsub.f32 %v203_v12, %v205_v13  ;;  %v501_v20 = vld [vmem:[%s896_s29 + $0x28] sm:$0xff]  ;;  %vm370_vm6 = vcmask 130048   ;;  %s515_s28 = sshll.u32 %s750_s13, 8  ;;  %s201_s24 = scalar_lea.vmem [#allocation8], %s495_s17 }
  0x54   : > { %v215_v19 = vsub.f32 %v497_v14, %v499_v15  ;;  %v503_v21 = vld [vmem:[%s889_s19 + $0x28] sm:$0xff]  ;;  %v505_v22 = vld [vmem:[%s896_s29 + $0x38] sm:$0xff]  ;;  %s387_s26 = sshll.u32 %s201_s24, 4  ;;  %s941_s25 = scalar_lea.hbm %s988_s2, %s515_s28  ;;  %s943_s26 = int_to_ptr.vmem [resolvable:$true] %s387_s26 }
  0x55   : > { %v225_v23 = vsub.f32 %v501_v20, %v503_v21  ;;  %v507_v24 = vld [vmem:[%s889_s19 + $0x38] sm:$0xff]  ;;  %v226_v25 = vadd.f32 %v224_v9, %v216_v16  ;;  %s374_s7 = scalar_lea.sflag [#allocation5], %s885_s16  ;;  %s632_s8 = scalar_lea.vmem %s943_s26, 256 }
  0x56   : > { %v217_v26 = vadd.f32 %v215_v19, %v207_v18  ;;  %v235_v27 = vsub.f32 %v505_v22, %v507_v24  ;;  %p633_p13 = scmp.ne.s32.totalorder %s943_s26, %s632_s8  ;;  %p998_p1 = scmp.ne.s32.totalorder %s993_s21, 0 }
  0x57   : > { %v236_v28 = vadd.f32 %v234_v17, %v226_v25  ;;  %s711_s13 = smov [#allocation8]  }
  0x58   : > { %v227_v29 = vadd.f32 %v225_v23, %v217_v26  ;;  %p634_p12 = pnand %p633_p13, %p998_p1  ;;  %s636_s30 = sshll.u32 %s711_s13, 4  ;;  %s637_s30 = int_to_ptr.vmem [resolvable:$false] %s636_s30 }
  0x59   : > { %253 = vrot.lane.b32.xlu0 %v236_v28, %s707_s20  ;;  %s638_s4 = scalar_lea.vmem %s637_s30, 512  ;;  %p639_p10 = scmp.lt.s32.totalorder %s943_s26, %s637_s30 }
  0x5a   : > { %v237_v30 = vadd.f32 %v235_v27, %v227_v29  ;;  %p635_p7 = pneg %p634_p12  ;;  %p640_p0 = scmp.lt.s32.totalorder %s638_s4, %s632_s8 }
  0x5c   : > { %p641_p2 = por %p640_p0, %p639_p10 }
  0x5d   : > { %255 = vrot.lane.b32.xlu0 %v237_v30, %s707_s20 }
  0x5e   : > { %p642_p4 = pnand %p641_p2, %p635_p7 }
  0xcb   : > { %v254_v31 = vpop.permute.xlu0 %253 }
  0xcc   : > { %260 = vst.msk [vmem:[#allocation2 + $0x2] sm:$0xff] %vm259_vm5, %v254_v31 }
  0xcf   : > { %v256_v32 = vpop.permute.xlu0 %255 }
  0xd0   : > { %261 = vst.msk [vmem:[#allocation2 + $0xa] sm:$0xff] %vm259_vm5, %v256_v32 }
  0xd3   : > { %v262_v33 = vld [vmem:[#allocation2] sm:$0xff] }
  0xd4   : > { %v270_v34 = vld [vmem:[#allocation2 + $0x1] sm:$0xff] }
  0xd5   : > { %v280_v43 = vld [vmem:[#allocation2 + $0x2] sm:$0xff] }
  0xd6   : > { %v282_v51 = vmul.f32 0.4405302, %v280_v43 }
  0xd7   : > { %v264_v35 = vld [vmem:[#allocation2 + $0x4] sm:$0xff]  ;;  %v265_v40 = vld [vmem:[#allocation2 + $0xc] sm:$0xff] }
  0xd8   : > { %v272_v36 = vld [vmem:[#allocation2 + $0x3] sm:$0xff]  ;;  %v266_v38 = vadd.f32 %v264_v35, %v262_v33  ;;  %v273_v42 = vld [vmem:[#allocation2 + $0xb] sm:$0xff] }
  0xd9   : > { %v263_v37 = vld [vmem:[#allocation2 + $0x8] sm:$0xff]  ;;  %v274_v39 = vadd.f32 %v272_v36, %v270_v34 }
  0xda   : > { %v271_v41 = vld [vmem:[#allocation2 + $0x9] sm:$0xff]  ;;  %v267_v44 = vadd.f32 %v265_v40, %v263_v37  ;;  %v268_v46 = vmul.f32 0.039172653, %v266_v38 }
  0xdb   : > { %v275_v45 = vadd.f32 %v273_v42, %v271_v41  ;;  %v276_v47 = vmul.f32 0.24056226, %v274_v39  ;;  %v281_v52 = vld [vmem:[#allocation2 + $0xa] sm:$0xff] }
  0xdc   : > { %v269_v48 = vmul.f32 0.039172653, %v267_v44  ;;  %v283_v55 = vmul.f32 0.4405302, %v281_v52 }
  0xdd   : > { %v277_v49 = vmul.f32 0.24056226, %v275_v45  ;;  %v278_v50 = vadd.f32 %v276_v47, %v268_v46 }
  0xdf   : > { %v284_v53 = vadd.f32 %v282_v51, %v278_v50  ;;  %v279_v54 = vadd.f32 %v277_v49, %v269_v48 }
  0xe1   : > { %288 = vrot.lane.b32.xlu0 %v284_v53, %s708_s5  ;;  %298 = vrot.lane.b32.xlu1 %v284_v53, %s709_s6  ;;  %v285_v56 = vadd.f32 %v283_v55, %v279_v54  ;;  %v318_v63 = vmul.f32 0.4405302, %v284_v53 }
  0xe3   : > { %v319_v0 = vmul.f32 0.4405302, %v285_v56 }
  0xe5   : > { %300 = vrot.lane.b32.xlu1 %v285_v56, %s709_s6 }
  0xe9   : > { %290 = vrot.lane.b32.xlu1 %v285_v56, %s708_s5 }
 0x153   : > { %v299_v57 = vpop.permute.xlu1 %298  ;;  %v289_v1 = vpop.permute.xlu0 %288 }
 0x154   : > { %v304_v58 = vadd.f32 %v299_v57, %v284_v53  ;;  %v294_v2 = vadd.f32 %v289_v1, %v284_v53 }
 0x156   : > { %v306_v59 = vmul.f32 0.24056226, %v304_v58  ;;  %v296_v5 = vmul.f32 0.039172653, %v294_v2 }
 0x157   : > { %v301_v60 = vpop.permute.xlu1 %300 }
 0x158   : > { %v305_v61 = vadd.f32 %v301_v60, %v285_v56  ;;  %310 = vrot.lane.b32.xlu0 %v306_v59, %s710_s14 }
 0x15a   : > { %v307_v62 = vmul.f32 0.24056226, %v305_v61 }
 0x15b   : > { %v291_v3 = vpop.permute.xlu1 %290 }
 0x15c   : > { %322 = vrot.lane.b32.xlu0 %v318_v63, %s709_s6  ;;  %312 = vrot.lane.b32.xlu1 %v307_v62, %s710_s14  ;;  %v295_v6 = vadd.f32 %v291_v3, %v285_v56 }
 0x15e   : > { %v297_v10 = vmul.f32 0.039172653, %v295_v6 }
 0x160   : > { %324 = vrot.lane.b32.xlu1 %v319_v0, %s709_s6 }
 0x1ca   : > { %v311_v4 = vpop.permute.xlu0 %310 }
 0x1cb   : > { %v316_v7 = vadd.f32 %v311_v4, %v296_v5 }
 0x1ce   : > { %v323_v8 = vpop.permute.xlu0 %322  ;;  %v313_v9 = vpop.permute.xlu1 %312 }
 0x1cf   : > { %v328_v11 = vadd.f32 %v323_v8, %v316_v7  ;;  %v317_v12 = vadd.f32 %v313_v9, %v297_v10 }
 0x1d1   : > { %332 = vrot.lane.b32.xlu0 %v328_v11, %s707_s20 }
 0x1d2   : > { %v325_v13 = vpop.permute.xlu1 %324 }
 0x1d3   : > { %v329_v14 = vadd.f32 %v325_v13, %v317_v12 }
 0x1d5   : > { %334 = vrot.lane.b32.xlu1 %v329_v14, %s707_s20 }
 0x243   : > { %v333_v15 = vpop.permute.xlu0 %332 }
 0x244   : > { %338 = vst.msk [vmem:[#allocation2 + $0x2] sm:$0xff] %vm259_vm5, %v333_v15 }
 0x247   : > { %v335_v16 = vpop.permute.xlu1 %334 }
 0x248   : > { %339 = vst.msk [vmem:[#allocation2 + $0xa] sm:$0xff] %vm259_vm5, %v335_v16 }
 0x24b   : > { %v340_v17 = vld [vmem:[#allocation2 + $0x2] sm:$0xff] }
 0x24c   : > { %346 = vrot.lane.b32.xlu0 %v340_v17, %s710_s14  ;;  %v342_v18 = vld [vmem:[#allocation2 + $0x1] sm:$0xff] }
 0x24f   : > { %v341_v19 = vld [vmem:[#allocation2 + $0xa] sm:$0xff] }
 0x250   : > { %358 = vrot.lane.b32.xlu0 %v342_v18, %s709_s6  ;;  %348 = vrot.lane.b32.xlu1 %v341_v19, %s710_s14  ;;  %v343_v20 = vld [vmem:[#allocation2 + $0x9] sm:$0xff] }
 0x254   : > { %360 = vrot.lane.b32.xlu1 %v343_v20, %s709_s6 }
 0x2be   : > { %v347_v21 = vpop.permute.xlu0 %346 }
 0x2bf   : > { %v352_v22 = vsub.f32 %v328_v11, %v347_v21 }
 0x2c1   : > { %v354_v26 = vand.u32 2147483647, %v352_v22 }
 0x2c2   : > { %v359_v23 = vpop.permute.xlu0 %358  ;;  %v349_v24 = vpop.permute.xlu1 %348 }
 0x2c3   : > { %v364_v25 = vsub.f32 %v328_v11, %v359_v23  ;;  %v353_v28 = vsub.f32 %v329_v14, %v349_v24 }
 0x2c5   : > { %v366_v27 = vand.u32 2147483647, %v364_v25  ;;  %v355_v32 = vand.u32 2147483647, %v353_v28 }
 0x2c6   : > { %v361_v29 = vpop.permute.xlu1 %360 }
 0x2c7   : > { %v368_v30 = vadd.f32 %v366_v27, %v354_v26  ;;  %v365_v31 = vsub.f32 %v329_v14, %v361_v29 }
 0x2c9   : > { %371 = vst.msk [vmem:[%s201_s24] sm:$0xff] %vm370_vm6, %v368_v30  ;;  %v367_v33 = vand.u32 2147483647, %v365_v31 }
 0x2cb   : > { %v369_v34 = vadd.f32 %v367_v33, %v355_v32 }
 0x2cd   : > { %372 = vst.msk [vmem:[%s201_s24 + $0x8] sm:$0xff] %vm370_vm6, %v369_v34 }
 0x2ce   : > { %645 = shalt.err (!%p642_p4)
}
 0x2cf   : > { %s646_s19 = scalar_lea.hbm %s941_s25, 256  ;;  %s650_s20 = scalar_lea.hbm %s988_s2, 512 }
 0x2d0   : > { %p647_p9 = scmp.ne.s32.totalorder %s941_s25, %s646_s19  ;;  %p651_p5 = scmp.lt.s32.totalorder %s941_s25, %s988_s2 }
 0x2d1   : > { %p652_p8 = scmp.lt.s32.totalorder %s650_s20, %s646_s19 }
 0x2d2   : > { %p648_p11 = pnand %p647_p9, %p998_p1 }
 0x2d3   : > { %p653_p6 = por %p652_p8, %p651_p5 }
 0x2d4   : > { %p649_p3 = pneg %p648_p11 }
 0x2d6   : > { %p654_p13 = pnand %p653_p6, %p649_p3 }
 0x2d8   : > { %657 = shalt.err (!%p654_p13)
}
 0x2d9   : > { %s712_s14 = smov 128   ;;  %s713_s17 = smov 8  }
 0x2da   : > { %520 = dma.vmem_to_hbm [thread:$0]  (%p998_p1), %s943_s26, 256, %s941_s25, %s374_s7, %s712_s14, %s712_s14, %s713_s17  }
 0x2db PF: > { %s402_s28 = sand.u32 1, %s688_s9   ;;  %p999_p12 = scmp.ne.s32.totalorder %s994_s22, 0 }
 0x2dc   : > { %p1000_p7 = scmp.ge.s32.totalorder %s700_s12, 2  ;;  %s403_s24 = scalar_lea.sflag [#allocation5], %s402_s28 }
 0x2de   : > { %p530_p10 = pnand %p1000_p7, %p999_p12 }
 0x2e0   : > { %p531_p0 = pneg %p530_p10 }
 0x2e2   : > { %683 = dma.done.wait (%p531_p0), %s403_s24, 256  }
 0x2e3   : > { %685 = vsyncadd (%p531_p0), %s403_s24, 4294967040  ;;  %p18_p2 = scmp.ge.s32.totalorder %s754_s15, 4   ;;  %s1001_s9 = smov %s692_s10 }
 0x2e4   : > { %s1002_s10 = smov %s696_s11  ;;  %s1003_s11 = smov %s766_s18 }
 0x2e5   : > { %s1004_s12 = smov %s754_s15  ;;  %20 = sbr.rel (!%p18_p2) target bundleno = 7 (0x7), region = 92 }
 0x2ea   :  { %408 = vsyncpa [#allocation4], 1 }
 0x2eb   :  { %410 = vsyncpa [#allocation4 + $0x1], 1 }
 0x2ec   :  { %411 = vsyncpa [#allocation7], 1 }
 0x2ed   :  { %413 = vsyncpa [#allocation7 + $0x1], 1 }
 0x2ee   :  { %414 = vsyncpa [#allocation5], 1 }
 0x2ef   :  { %416 = vsyncpa [#allocation5 + $0x1], 1 }

</bundles_post_ra>
